<compile_context>
chip_gen: v7x
topology: tpu7x:2x2x1
jax: 0.10.0
libtpu: 0.0.40
codegen_flags: <defaults>
</compile_context>

<pallas_src>
import jax
import jax.numpy as jnp
from jax.experimental import pallas as pl
from jax.experimental.pallas import tpu as pltpu


# ----------------------------------------------------------------------------
# helpers
# ----------------------------------------------------------------------------
def _pick_tile(dim, target):
    """Use `target` if it divides `dim`, else fall back to the full dim
    (keeps small / demo shapes runnable while real shapes get tiled)."""
    return target if dim % target == 0 else dim


def _rotate_half(x):
    """rotate_half(x) = concat(-x[..., d/2:], x[..., :d/2], axis=-1).

    When head_dim is lane-aligned, a half-rotation (shift = d/2) is
    direction-agnostic, so pltpu.roll + a sign select reproduces it exactly
    and runs on the XLU slot instead of doing slice/concat relayout copies.
    """
    d = x.shape[-1]
    if d % 128 == 0:
        rolled = pltpu.roll(x, d // 2, axis=-1)
        idx = jax.lax.broadcasted_iota(jnp.int32, x.shape, x.ndim - 1)
        return jnp.where(idx < d // 2, -rolled, rolled)
    # small / unaligned head dims (demo config): plain slice + concat
    return jnp.concatenate([-x[..., d // 2:], x[..., :d // 2]], axis=-1)


# ----------------------------------------------------------------------------
# Tiled linear projection:  out = x @ w_t + b
#   x: (M, K), w_t: (K, N) (pre-transposed), b: (1, N)
# ----------------------------------------------------------------------------
def _linear_kernel(x_ref, w_ref, b_ref, o_ref, acc_ref):
    k = pl.program_id(2)

    @pl.when(k == 0)
    def _():
        acc_ref[...] = jnp.zeros_like(acc_ref)

    acc_ref[...] += jnp.dot(x_ref[...], w_ref[...],
                            preferred_element_type=jnp.float32)

    @pl.when(k == pl.num_programs(2) - 1)
    def _():
        o_ref[...] = (acc_ref[...]
                      + b_ref[...].astype(jnp.float32)).astype(o_ref.dtype)


def pallas_linear(x2d, w_t, b2d, *, tm=256, tn=256, tk=512):
    M, K = x2d.shape
    N = w_t.shape[1]
    tm, tn, tk = _pick_tile(M, tm), _pick_tile(N, tn), _pick_tile(K, tk)
    return pl.pallas_call(
        _linear_kernel,
        out_shape=jax.ShapeDtypeStruct((M, N), x2d.dtype),
        grid=(M // tm, N // tn, K // tk),
        in_specs=[
            pl.BlockSpec((tm, tk), lambda i, j, k: (i, k)),
            pl.BlockSpec((tk, tn), lambda i, j, k: (k, j)),
            pl.BlockSpec((1, tn), lambda i, j, k: (0, j)),
        ],
        out_specs=pl.BlockSpec((tm, tn), lambda i, j, k: (i, j)),
        scratch_shapes=[pltpu.VMEM((tm, tn), jnp.float32)],
        compiler_params=pltpu.CompilerParams(
            dimension_semantics=("parallel", "parallel", "arbitrary")),
    )(x2d, w_t, b2d)


# ----------------------------------------------------------------------------
# RoPE kernel (used for K: applied once per KV head, not groups× per q head).
# ----------------------------------------------------------------------------
def _rope_kernel(x_ref, cos_ref, sin_ref, o_ref):
    x = x_ref[...].astype(jnp.float32)
    cos = cos_ref[...].astype(jnp.float32)
    sin = sin_ref[...].astype(jnp.float32)
    o_ref[...] = (x * cos + _rotate_half(x) * sin).astype(o_ref.dtype)


def pallas_rope(x, cos, sin, *, ts=256):
    """x: (B, H, S, D); cos/sin: (S, D)."""
    B, H, S, D = x.shape
    ts = _pick_tile(S, ts)
    x_map = lambda b, h, i: (b, h, i, 0)
    cs_map = lambda b, h, i: (i, 0)
    return pl.pallas_call(
        _rope_kernel,
        out_shape=jax.ShapeDtypeStruct(x.shape, x.dtype),
        grid=(B, H, S // ts),
        in_specs=[
            pl.BlockSpec((None, None, ts, D), x_map),
            pl.BlockSpec((ts, D), cs_map),
            pl.BlockSpec((ts, D), cs_map),
        ],
        out_specs=pl.BlockSpec((None, None, ts, D), x_map),
        compiler_params=pltpu.CompilerParams(
            dimension_semantics=("parallel", "parallel", "parallel")),
    )(x, cos, sin)


# ----------------------------------------------------------------------------
# Flash-style causal attention with fused Q-RoPE and GQA head mapping.
# Grid: (B, H, num_q_tiles, num_kv_tiles) — kv innermost ("arbitrary").
# ----------------------------------------------------------------------------
def _flash_kernel(q_ref, k_ref, v_ref, cos_ref, sin_ref, o_ref,
                  q_sc, m_sc, l_sc, acc_sc):
    qi = pl.program_id(2)
    ki = pl.program_id(3)
    tq, d = q_ref.shape
    tk = k_ref.shape[0]
    scale = 1.0 / float(d) ** 0.5

    @pl.when(ki == 0)
    def _init():
        # RoPE the q tile once per (b, h, qi), pre-scaled by 1/sqrt(d).
        qf = q_ref[...].astype(jnp.float32)
        cos = cos_ref[...].astype(jnp.float32)
        sin = sin_ref[...].astype(jnp.float32)
        q_sc[...] = ((qf * cos + _rotate_half(qf) * sin)
                     * jnp.float32(scale)).astype(q_sc.dtype)
        m_sc[...] = jnp.full(m_sc.shape, -jnp.inf, dtype=jnp.float32)
        l_sc[...] = jnp.zeros_like(l_sc)
        acc_sc[...] = jnp.zeros_like(acc_sc)

    # Skip KV tiles that lie entirely above the causal diagonal.
    @pl.when(ki * tk <= qi * tq + (tq - 1))
    def _compute():
        k = k_ref[...]
        v = v_ref[...]
        # q @ k^T, contracting on head_dim, no transposed copy of k.
        s = jax.lax.dot_general(
            q_sc[...], k, (((1,), (1,)), ((), ())),
            preferred_element_type=jnp.float32)                   # (tq, tk)
        q_pos = qi * tq + jax.lax.broadcasted_iota(jnp.int32, (tq, tk), 0)
        k_pos = ki * tk + jax.lax.broadcasted_iota(jnp.int32, (tq, tk), 1)
        s = jnp.where(q_pos >= k_pos, s, jnp.float32(-1e30))      # causal

        m_prev = m_sc[...]
        m_new = jnp.maximum(m_prev, jnp.max(s, axis=-1, keepdims=True))
        alpha = jnp.exp(m_prev - m_new)
        p = jnp.exp(s - m_new)
        l_sc[...] = alpha * l_sc[...] + jnp.sum(p, axis=-1, keepdims=True)
        acc_sc[...] = alpha * acc_sc[...] + jnp.dot(
            p.astype(v.dtype), v, preferred_element_type=jnp.float32)
        m_sc[...] = m_new

    @pl.when(ki == pl.num_programs(3) - 1)
    def _finalize():
        inv_l = pl.reciprocal(l_sc[...], approx=True)
        o_ref[...] = (acc_sc[...] * inv_l).astype(o_ref.dtype)


def pallas_flash_attention(q, k_roped, v, cos, sin, num_kv_groups,
                           *, tq=128, tk=128):
    """q (pre-RoPE): (B, H, S, D); k_roped/v: (B, Hkv, S, D); cos/sin: (S, D)."""
    B, H, S, D = q.shape
    tq = _pick_tile(S, tq)
    tk = _pick_tile(S, tk)

    q_map = lambda b, h, i, j: (b, h, i, 0)
    kv_map = lambda b, h, i, j: (b, h // num_kv_groups, j, 0)
    cs_map = lambda b, h, i, j: (i, 0)

    return pl.pallas_call(
        _flash_kernel,
        out_shape=jax.ShapeDtypeStruct((B, H, S, D), q.dtype),
        grid=(B, H, S // tq, S // tk),
        in_specs=[
            pl.BlockSpec((None, None, tq, D), q_map),
            pl.BlockSpec((None, None, tk, D), kv_map),
            pl.BlockSpec((None, None, tk, D), kv_map),
            pl.BlockSpec((tq, D), cs_map),
            pl.BlockSpec((tq, D), cs_map),
        ],
        out_specs=pl.BlockSpec((None, None, tq, D), q_map),
        scratch_shapes=[
            pltpu.VMEM((tq, D), q.dtype),       # RoPE'd, pre-scaled q tile
            pltpu.VMEM((tq, 1), jnp.float32),   # running row max
            pltpu.VMEM((tq, 1), jnp.float32),   # running denominator
            pltpu.VMEM((tq, D), jnp.float32),   # output accumulator
        ],
        compiler_params=pltpu.CompilerParams(
            dimension_semantics=("parallel", "parallel", "parallel",
                                 "arbitrary")),
    )(q, k_roped, v, cos, sin)


# ----------------------------------------------------------------------------
# Param prep (one-time): torch (out, in) weights -> (in, out); biases -> (1, N)
# ----------------------------------------------------------------------------
def prepare_params(params):
    def bias(b, n, dtype):
        if b is None:
            return jnp.zeros((1, n), dtype)
        return jnp.asarray(b).reshape(1, n).astype(dtype)

    w_qkv_t = jnp.asarray(params["w_qkv"]).T
    w_o_t = jnp.asarray(params["w_o"]).T
    return {
        "w_qkv_t": w_qkv_t,
        "b_qkv": bias(params["b_qkv"], w_qkv_t.shape[1], w_qkv_t.dtype),
        "w_o_t": w_o_t,
        "b_o": bias(params["b_o"], w_o_t.shape[1], w_o_t.dtype),
    }


# ----------------------------------------------------------------------------
# Full module forward.
# ----------------------------------------------------------------------------
def attention_forward(x, prep, cos, sin, cfg):
    B, S, hidden = x.shape
    nh, nkv, hd = cfg["num_heads"], cfg["num_kv_heads"], cfg["head_dim"]
    kv_hidden = nkv * hd
    groups = nh // nkv

    # fused qkv projection (tiled MXU matmul)
    qkv = pallas_linear(x.reshape(B * S, hidden), prep["w_qkv_t"], prep["b_qkv"])
    qkv = qkv.reshape(B, S, hidden + 2 * kv_hidden)
    q = qkv[..., :hidden]
    k = qkv[..., hidden:hidden + kv_hidden]
    v = qkv[..., hidden + kv_hidden:]

    # split heads -> (B, heads, S, D)
    # TODO(synk): fuse head split/merge into the attention BlockSpecs
    # (lane-dense (B, S, hidden) in/out) once head_dim is lane-aligned.
    q = q.reshape(B, S, nh, hd).transpose(0, 2, 1, 3)
    k = k.reshape(B, S, nkv, hd).transpose(0, 2, 1, 3)
    v = v.reshape(B, S, nkv, hd).transpose(0, 2, 1, 3)

    # RoPE K once per KV head; Q RoPE is fused inside the flash kernel.
    k = pallas_rope(k, cos, sin)

    # flash-style causal attention with GQA head mapping
    attn = pallas_flash_attention(q, k, v, cos, sin, groups)

    # merge heads, output projection
    attn = attn.transpose(0, 2, 1, 3).reshape(B * S, hidden)
    out = pallas_linear(attn, prep["w_o_t"], prep["b_o"])
    return out.reshape(B, S, hidden)


# ----------------------------------------------------------------------------
# Pure-JAX reference (mirrors the PyTorch forward exactly).
# ----------------------------------------------------------------------------
def reference_forward(x, params, cos, sin, cfg):
    B, S, _ = x.shape
    nh, nkv, hd = cfg["num_heads"], cfg["num_kv_heads"], cfg["head_dim"]
    hidden = cfg["hidden_size"]
    kv_hidden = nkv * hd
    groups = nh // nkv

    qkv = x @ params["w_qkv"].T + params["b_qkv"]
    q, k, v = (qkv[..., :hidden],
               qkv[..., hidden:hidden + kv_hidden],
               qkv[..., hidden + kv_hidden:])
    q = q.reshape(B, S, nh, hd).transpose(0, 2, 1, 3)
    k = k.reshape(B, S, nkv, hd).transpose(0, 2, 1, 3)
    v = v.reshape(B, S, nkv, hd).transpose(0, 2, 1, 3)

    def rot(t):
        return jnp.concatenate([-t[..., hd // 2:], t[..., :hd // 2]], axis=-1)

    c = cos[None, None]
    s = sin[None, None]
    q = q * c + rot(q) * s
    k = k * c + rot(k) * s

    k = jnp.repeat(k, groups, axis=1)
    v = jnp.repeat(v, groups, axis=1)

    scores = jnp.einsum("bhqd,bhkd->bhqk", q, k) / jnp.sqrt(jnp.float32(hd))
    causal = jnp.tril(jnp.ones((S, S), bool))
    scores = jnp.where(causal[None, None], scores, -jnp.inf)
    probs = jax.nn.softmax(scores, axis=-1)
    attn = jnp.einsum("bhqk,bhkd->bhqd", probs, v)
    attn = attn.transpose(0, 2, 1, 3).reshape(B, S, hidden)
    return attn @ params["w_o"].T


# ----------------------------------------------------------------------------
if __name__ == "__main__":
    # small config consistent with the module: hidden = num_heads * head_dim
    cfg = dict(hidden_size=32, num_heads=4, num_kv_heads=2, head_dim=8)
    B, S = 2, 8
    hidden = cfg["hidden_size"]
    kv_hidden = cfg["num_kv_heads"] * cfg["head_dim"]
    qkv_out = hidden + 2 * kv_hidden

    key = jax.random.PRNGKey(0)
    kx, kqkv, kbq, ko = jax.random.split(key, 4)

    x = jax.random.normal(kx, (B, S, hidden), jnp.float32)

    # deterministic synthetic weights (torch nn.Linear layout: (out, in))
    params = {
        "w_qkv": 0.05 * jax.random.normal(kqkv, (qkv_out, hidden), jnp.float32),
        "b_qkv": 0.01 * jax.random.normal(kbq, (qkv_out,), jnp.float32),
        "w_o":   0.05 * jax.random.normal(ko, (hidden, hidden), jnp.float32),
        "b_o":   None,   # attn_out_bias = False
    }
    prep = prepare_params(params)   # one-time transpose, outside the forward

    # standard RoPE freqs: cos/sin of shape (S, head_dim)
    hd = cfg["head_dim"]
    inv_freq = 1.0 / (10000.0 ** (jnp.arange(0, hd, 2, dtype=jnp.float32) / hd))
    pos = jnp.arange(S, dtype=jnp.float32)
    freqs = pos[:, None] * inv_freq[None, :]          # (S, hd/2)
    emb = jnp.concatenate([freqs, freqs], axis=-1)    # (S, hd)
    cos, sin = jnp.cos(emb), jnp.sin(emb)

    out = attention_forward(x, prep, cos, sin, cfg)
    out = jax.block_until_ready(out)

    ref = reference_forward(x, params, cos, sin, cfg)
    assert out.shape == (B, S, hidden)
    assert jnp.allclose(out, ref, rtol=2e-2, atol=2e-2), "mismatch vs JAX reference"

    print("KERNEL_OK")
</pallas_src>

<mosaic_0001>
module attributes {stable_mosaic.version = 11 : i64} {
  func.func @_linear_kernel(%arg0: i32, %arg1: i32, %arg2: i32, %arg3: memref<16x32xf32, #tpu.memory_space<vmem>>, %arg4: memref<32x64xf32, #tpu.memory_space<vmem>>, %arg5: memref<1x64xf32, #tpu.memory_space<vmem>>, %arg6: memref<16x64xf32, #tpu.memory_space<vmem>>, %arg7: memref<16x64xf32, #tpu.memory_space<vmem>>) attributes {dimension_semantics = [#tpu.dimension_semantics<parallel>, #tpu.dimension_semantics<parallel>, #tpu.dimension_semantics<arbitrary>], iteration_bounds = array<i64: 1, 1, 1>, scalar_prefetch = 0 : i64, scratch_operands = 1 : i64, tpu.core_type = #tpu.core_type<tc>, window_params = [{transform_indices = @transform_0, window_bounds = array<i64: 16, 32>}, {transform_indices = @transform_1, window_bounds = array<i64: 32, 64>}, {transform_indices = @transform_2, window_bounds = array<i64: 1, 64>}, {transform_indices = @transform_3, window_bounds = array<i64: 16, 64>}]} {
    %c0_i32 = arith.constant 0 : i32
    %0 = arith.cmpi eq, %arg2, %c0_i32 : i32
    %1 = arith.extui %0 : i1 to i32
    %c0_i32_0 = arith.constant 0 : i32
    %2 = arith.cmpi ne, %1, %c0_i32_0 : i32
    scf.if %2 {
      %cst_10 = arith.constant 0.000000e+00 : f32
      %12 = vector.broadcast %cst_10 : f32 to vector<16x64xf32>
      %c0_11 = arith.constant 0 : index
      %c0_12 = arith.constant 0 : index
      %13 = vector.load %arg7[%c0_11, %c0_12] : memref<16x64xf32, #tpu.memory_space<vmem>>, vector<16x64xf32>
      tpu.vector_store %arg7[%c0_11, %c0_12], %12 {strides = array<i32>} : memref<16x64xf32, #tpu.memory_space<vmem>>, vector<16x64xf32>,
    } else {
    }
    %c0 = arith.constant 0 : index
    %c0_1 = arith.constant 0 : index
    %3 = vector.load %arg7[%c0, %c0_1] : memref<16x64xf32, #tpu.memory_space<vmem>>, vector<16x64xf32>
    %c0_2 = arith.constant 0 : index
    %c0_3 = arith.constant 0 : index
    %4 = vector.load %arg3[%c0_2, %c0_3] : memref<16x32xf32, #tpu.memory_space<vmem>>, vector<16x32xf32>
    %c0_4 = arith.constant 0 : index
    %c0_5 = arith.constant 0 : index
    %5 = vector.load %arg4[%c0_4, %c0_5] : memref<32x64xf32, #tpu.memory_space<vmem>>, vector<32x64xf32>
    %cst = arith.constant dense<0.000000e+00> : vector<16x64xf32>
    %6 = tpu.matmul %4, %5, %cst {dimension_numbers = #tpu.dot_dimension_numbers<[1], [0], [0], [1], [0, 0, 1, 1], [], []>} : vector<16x32xf32>, vector<32x64xf32>, vector<16x64xf32> -> vector<16x64xf32>
    %7 = arith.addf %3, %6 : vector<16x64xf32>
    %c0_6 = arith.constant 0 : index
    %c0_7 = arith.constant 0 : index
    %8 = vector.load %arg7[%c0_6, %c0_7] : memref<16x64xf32, #tpu.memory_space<vmem>>, vector<16x64xf32>
    tpu.vector_store %arg7[%c0_6, %c0_7], %7 {strides = array<i32>} : memref<16x64xf32, #tpu.memory_space<vmem>>, vector<16x64xf32>,
    %c0_i32_8 = arith.constant 0 : i32
    %9 = arith.cmpi eq, %arg2, %c0_i32_8 : i32
    %10 = arith.extui %9 : i1 to i32
    %c0_i32_9 = arith.constant 0 : i32
    %11 = arith.cmpi ne, %10, %c0_i32_9 : i32
    scf.if %11 {
      %c0_10 = arith.constant 0 : index
      %c0_11 = arith.constant 0 : index
      %12 = vector.load %arg7[%c0_10, %c0_11] : memref<16x64xf32, #tpu.memory_space<vmem>>, vector<16x64xf32>
      %c0_12 = arith.constant 0 : index
      %c0_13 = arith.constant 0 : index
      %13 = vector.load %arg5[%c0_12, %c0_13] : memref<1x64xf32, #tpu.memory_space<vmem>>, vector<1x64xf32>
      %14 = vector.broadcast %13 : vector<1x64xf32> to vector<16x64xf32>
      %15 = arith.addf %12, %14 : vector<16x64xf32>
      %c0_14 = arith.constant 0 : index
      %c0_15 = arith.constant 0 : index
      %16 = vector.load %arg6[%c0_14, %c0_15] : memref<16x64xf32, #tpu.memory_space<vmem>>, vector<16x64xf32>
      tpu.vector_store %arg6[%c0_14, %c0_15], %15 {strides = array<i32>} : memref<16x64xf32, #tpu.memory_space<vmem>>, vector<16x64xf32>,
    } else {
    }
    return
  }
  func.func @transform_0(%arg0: i32, %arg1: i32, %arg2: i32) -> (i32, i32) {
    %c0_i32 = arith.constant 0 : i32
    return %arg0, %arg2 : i32, i32
  }
  func.func @transform_1(%arg0: i32, %arg1: i32, %arg2: i32) -> (i32, i32) {
    %c0_i32 = arith.constant 0 : i32
    return %arg2, %arg1 : i32, i32
  }
  func.func @transform_2(%arg0: i32, %arg1: i32, %arg2: i32) -> (i32, i32) {
    %c0_i32 = arith.constant 0 : i32
    %c0_i32_0 = arith.constant 0 : i32
    return %c0_i32, %arg1 : i32, i32
  }
  func.func @transform_3(%arg0: i32, %arg1: i32, %arg2: i32) -> (i32, i32) {
    %c0_i32 = arith.constant 0 : i32
    return %arg0, %arg1 : i32, i32
  }
}

</mosaic_0001>

<bundles_post_ra>
// kernel: tpu_custom_call.1
= control target key start
LH: loop header
LB: loop body
LE: loop exit
PB: predicated region body
PF: predicated region fallthrough
CT: control target
= control target key end

     0   :  { %8 = vsyncpa [#allocation4], 0  ;;  %s365_s0 = inlined_call_operand.hbm [shape: f32[16,32], index: 0, kind: input, shape index: {}]   ;;  %s366_s1 = inlined_call_operand.hbm [shape: f32[32,64], index: 1, kind: input, shape index: {}]   ;;  %s367_s2 = inlined_call_operand.vmem [shape: f32[1,64], index: 2, kind: input, shape index: {}]   ;;  %s368_s3 = inlined_call_operand.hbm [shape: f32[16,64], index: 3, kind: output, shape index: {}]  }
   0x1   :  { %9 = vsyncpa [#allocation7], 0 }
   0x2   :  { %10 = vsyncpa [#allocation5], 0  ;;  %s285_s12 = smov [#allocation3]   ;;  %s213_s16 = scalar_lea.hbm %s365_s0, 256 }
   0x3   :  { %s16_s13 = sshll.u32 %s285_s12, 4  ;;  %p214_p0 = scmp.ne.s32.totalorder %s365_s0, %s213_s16  ;;  %s17_s13 = int_to_ptr.vmem [resolvable:$true] %s16_s13 }
   0x4   :  { %p217_p1 = scmp.lt.u32.totalorder %s213_s16, %s365_s0 }
   0x6   :  { %p219_p2 = pnand %p217_p1, %p214_p0 }
   0x8   :  { %222 = shalt.err (!%p219_p2)
}
   0x9   :  { %s223_s21 = scalar_lea.vmem %s17_s13, 256  ;;  %p228_p4 = scmp.lt.s32.totalorder %s17_s13, %s17_s13 }
   0xa   :  { %p224_p3 = scmp.ne.s32.totalorder %s17_s13, %s223_s21  ;;  %p229_p5 = scmp.lt.s32.totalorder %s223_s21, %s223_s21 }
   0xc   :  { %p230_p6 = por %p229_p5, %p228_p4 }
   0xe   :  { %p231_p7 = pnand %p230_p6, %p224_p3 }
  0x10   :  { %234 = shalt.err (!%p231_p7)
}
  0x11   :  { %s286_s22 = smov 128   ;;  %s287_s23 = smov 8  }
  0x12   :  { %22 = dma.hbm_to_vmem [thread:$0]  %s365_s0, 256, %s17_s13, [#allocation4], %s286_s22, %s286_s22, %s287_s23  }
  0x13   :  { %s288_s26 = smov [#allocation6]   ;;  %s235_s30 = scalar_lea.hbm %s366_s1, 512 }
  0x14   :  { %s28_s27 = sshll.u32 %s288_s26, 4  ;;  %p236_p8 = scmp.ne.s32.totalorder %s366_s1, %s235_s30  ;;  %s29_s27 = int_to_ptr.vmem [resolvable:$true] %s28_s27 }
  0x15   :  { %p239_p9 = scmp.lt.u32.totalorder %s235_s30, %s366_s1 }
  0x17   :  { %p241_p10 = pnand %p239_p9, %p236_p8 }
  0x19   :  { %244 = shalt.err (!%p241_p10)
}
  0x1a   :  { %s245_s8 = scalar_lea.vmem %s29_s27, 512  ;;  %p250_p12 = scmp.lt.s32.totalorder %s29_s27, %s29_s27 }
  0x1b   :  { %p246_p11 = scmp.ne.s32.totalorder %s29_s27, %s245_s8  ;;  %p251_p13 = scmp.lt.s32.totalorder %s245_s8, %s245_s8 }
  0x1d   :  { %p252_p0 = por %p251_p13, %p250_p12 }
  0x1f   :  { %p253_p1 = pnand %p252_p0, %p246_p11 }
  0x21   :  { %256 = shalt.err (!%p253_p1)
}
  0x22   :  { %34 = dma.hbm_to_vmem [thread:$0]  %s366_s1, 512, %s29_s27, [#allocation7], %s286_s22, %s286_s22, %s287_s23  }
  0x23   :  { %279 = dma.done.wait [#allocation4], 256  }
  0x24   :  { %280 = vsyncadd [#allocation4], 4294967040 }
  0x25   :  { %281 = dma.done.wait [#allocation7], 512  }
  0x26   :  { %282 = vsyncadd [#allocation7], 4294966784  ;;  %vm47_vm0 = vcmask 523264   ;;  %v289_v0 = vmov 0.0   ;;  %vm58_vm1 = vcmask 261120   ;;  %v54_v1 = vld [vmem:[#allocation6] sm:$0xff] }
  0x27   :  { %49 = vst.msk [vmem:[#allocation2 + $0x8] sm:$0xff] %vm47_vm0, %v289_v0  ;;  %48 = vst.msk [vmem:[#allocation2] sm:$0xff] %vm47_vm0, %v289_v0  ;;  %v55_v2 = vld [vmem:[#allocation6 + $0x8] sm:$0xff]  ;;  %v56_v3 = vld [vmem:[#allocation6 + $0x10] sm:$0xff]  ;;  %s290_s11 = smov [#allocation8]  }
  0x28   :  { %v199_v4 = vpack.c.bf16 %v55_v2, %v54_v1  ;;  %v57_v5 = vld [vmem:[#allocation6 + $0x18] sm:$0xff]  ;;  %v52_v6 = vld [vmem:[#allocation3] sm:$0xff]  ;;  %v181_v15 = vld [vmem:[%s367_s2] ss:$0 sm:$0xff]  ;;  %s166_s12 = sshll.u32 %s290_s11, 4  ;;  %s167_s12 = int_to_ptr.vmem [resolvable:$true] %s166_s12 }
  0x29   :  { %v203_v7 = vpack.c.bf16 %v57_v5, %v56_v3  ;;  %196 = vmatprep.mubr.msk.f32.mxu0 %vm58_vm1, %v52_v6  ;;  %v53_v8 = vld [vmem:[#allocation3 + $0x8] sm:$0xff]  ;;  %s257_s13 = scalar_lea.vmem %s167_s12, 256  ;;  %p262_p3 = scmp.lt.s32.totalorder %s167_s12, %s167_s12 }
  0x2a   :  { %200 = vmatprep.subr.bf16.mxu0 %v199_v4  ;;  %p258_p2 = scmp.ne.s32.totalorder %s167_s12, %s257_s13  ;;  %p263_p4 = scmp.lt.s32.totalorder %s257_s13, %s257_s13 }
  0x2b   :  { %202 = vmatpush3.bf16.msra.mxu0 %v199_v4 }
  0x2c   :  { %204 = vmatprep.subr.bf16.mxu0 %v203_v7  ;;  %p264_p5 = por %p263_p4, %p262_p3 }
  0x2e   :  { %v51_v9 = vld [vmem:[#allocation2 + $0x8] sm:$0xff]  ;;  %v50_v10 = vld [vmem:[#allocation2] sm:$0xff]  ;;  %p265_p6 = pnand %p264_p5, %p258_p2 }
  0x2f   :  { %206 = vmatpush3.bf16.msra.mxu0 %v203_v7 }
  0x32   :  { %197 = vmatmul.mubr.msk.f32.vlgmr.msra.gmra.mrb[0].mxu0 %vm58_vm1, %v53_v8 }
 0x105   :  { %v198_v11 = vpop.f32.mrb[0].mxu0 }
 0x106   :  { %v141_v12 = vadd.f32 %v198_v11, %v51_v9  ;;  %v131_v13 = vpop.f32.mrb[1].mxu0 }
 0x107   :  { %v140_v14 = vadd.f32 %v131_v13, %v50_v10 }
 0x108   :  { %144 = vst.msk [vmem:[#allocation2 + $0x8] sm:$0xff] %vm47_vm0, %v141_v12 }
 0x109   :  { %143 = vst.msk [vmem:[#allocation2] sm:$0xff] %vm47_vm0, %v140_v14 }
 0x10f   :  { %v149_v16 = vld [vmem:[#allocation2 + $0x8] sm:$0xff] }
 0x110   :  { %v148_v17 = vld [vmem:[#allocation2] sm:$0xff]  ;;  %v158_v18 = vadd.f32 %v181_v15, %v149_v16 }
 0x111   :  { %v157_v19 = vadd.f32 %v181_v15, %v148_v17 }
 0x112   :  { %160 = vst.msk [vmem:[#allocation8 + $0x8] sm:$0xff] %vm47_vm0, %v158_v18 }
 0x113   :  { %159 = vst.msk [vmem:[#allocation8] sm:$0xff] %vm47_vm0, %v157_v19 }
 0x114   :  { %268 = shalt.err (!%p265_p6)
}
 0x115   :  { %s269_s15 = scalar_lea.hbm %s368_s3, 256 }
 0x116   :  { %p270_p7 = scmp.ne.s32.totalorder %s368_s3, %s269_s15  ;;  %p273_p8 = scmp.lt.u32.totalorder %s269_s15, %s368_s3 }
 0x118   :  { %p275_p9 = pnand %p273_p8, %p270_p7 }
 0x11a   :  { %278 = shalt.err (!%p275_p9)
}
 0x11b   :  { %172 = dma.vmem_to_hbm [thread:$0]  %s167_s12, 256, %s368_s3, [#allocation5], %s286_s22, %s286_s22, %s287_s23  }
 0x11c   :  { %283 = dma.done.wait [#allocation5], 256  }
 0x11d   :  { %284 = vsyncadd [#allocation5], 4294967040 }
 0x11e   :  { %176 = vsyncpa [#allocation4], 1 }
 0x11f   :  { %177 = vsyncpa [#allocation7], 1 }
 0x120   :  { %178 = vsyncpa [#allocation5], 1 }

</bundles_post_ra>
